<compile_context>
chip_gen: v6e
topology: v6e:2x2x1
jax: 0.10.0
libtpu: 0.0.40
codegen_flags: <defaults>
</compile_context>

<pallas_src>
import functools

import jax
import jax.numpy as jnp
from jax.experimental import pallas as pl
from jax.experimental.pallas import tpu as pltpu


def _round_up(x, m):
    return ((x + m - 1) // m) * m


def _pick_hw_tile(hw, target):
    """Largest multiple of 128 that divides HW (<= target); else the full extent."""
    if hw % 128 != 0:
        return hw  # full-extent last dim is always a legal block
    best, t = 128, 128
    while t <= min(hw, target):
        if hw % t == 0:
            best = t
        t += 128
    return best


def _pick_batch_block(n, max_bn):
    """Batch block that keeps the output block's second-minor dim legal
    (multiple of 8 or equal to the full batch dim) and divides N."""
    if n <= max_bn:
        return n
    start = max_bn - (max_bn % 8)
    for bn in range(start, 0, -8):
        if bn > 0 and n % bn == 0:
            return bn
    return n  # full batch: always legal


def _head_kernel(x_ref, w_ref, shift_ref, o_ref, acc_ref, *, inv_hw, bn):
    """One grid step of the fused 1x1-conv + shift + ReLU + global-avg-pool head.

    x_ref:     (bn, Cin, thw)  activation tile, NCHW layout (H*W on the lane axis)
    w_ref:     (tco, Cin)      bf16 weight tile (BN scale folded in); VMEM-resident
    shift_ref: (tco, 1)        f32 folded conv-bias / BN shift
    o_ref:     (bn, tco)       pooled output tile (Cout on the 128-lane axis)
    acc_ref:   (tco, bn)       f32 GAP accumulator (persists over the HW grid axis)
    """
    k = pl.program_id(2)

    @pl.when(k == 0)
    def _():
        acc_ref[...] = jnp.zeros_like(acc_ref)

    cols = []
    for b in range(bn):  # bn is small & static -> unrolled
        xb = x_ref[b].astype(w_ref.dtype)                 # no-op if x is already bf16
        # (tco, Cin) @ (Cin, thw) -> (tco, thw); bf16 MXU path, f32 accumulation.
        yb = jnp.dot(w_ref[...], xb, preferred_element_type=jnp.float32)
        yb = jnp.maximum(yb + shift_ref[...], 0.0)        # bias/BN shift + ReLU
        cols.append(jnp.sum(yb, axis=1, keepdims=True))   # (tco, 1) partial GAP
    acc_ref[...] += jnp.concatenate(cols, axis=1) if bn > 1 else cols[0]

    @pl.when(k == pl.num_programs(2) - 1)
    def _():
        # One small (tco, bn) -> (bn, tco) transpose per output tile; the store
        # itself is lane-dense (Cout on the lane axis -> unmasked vst).
        o_ref[...] = (acc_ref[...] * inv_hw).T.astype(o_ref.dtype)


def vgg_head(x, weight, *, bias=None, bn_params=None,
             compute_dtype=jnp.bfloat16, out_dtype=jnp.float32,
             max_batch_block=8, hw_tile_target=2048, cout_splits=None,
             cast_input=True):
    """Fused 1x1 conv (+ optional inference BN) + ReLU + global average pool.

    x:        (N, Cin, H, W) NCHW (consumed directly -- no host-side transpose)
    weight:   (Cout, Cin)    PyTorch Conv2d weight squeezed over the 1x1 kernel dims
    bias:     optional (Cout,)
    bn_params: optional dict(gamma, beta, mean, var, eps) -- inference-mode BN
    returns:  (N, Cout) f32 == flatten(AdaptiveAvgPool2d((1,1))(relu(bn(conv(x)))))
    """
    N, Cin, H, W = x.shape
    Cout = weight.shape[0]
    HW = H * W

    # ---- host-side (tiny, one-off) folding: bias + BN -> per-channel scale/shift
    scale = jnp.ones((Cout,), jnp.float32)
    shift = jnp.zeros((Cout,), jnp.float32)
    if bias is not None:
        shift = shift + bias.astype(jnp.float32)
    if bn_params is not None:
        gamma = bn_params["gamma"].astype(jnp.float32)
        beta = bn_params["beta"].astype(jnp.float32)
        mean = bn_params["mean"].astype(jnp.float32)
        var = bn_params["var"].astype(jnp.float32)
        eps = bn_params.get("eps", 1e-5)
        inv_std = gamma * jax.lax.rsqrt(var + eps)
        shift = (shift - mean) * inv_std + beta
        scale = scale * inv_std
    w = weight.astype(jnp.float32) * scale[:, None]            # (Cout, Cin)

    # ---- pad Cout to a 128 multiple so the pooled output is lane-dense
    cout_pad = max(_round_up(Cout, 128), 128)
    if cout_pad != Cout:
        w = jnp.pad(w, ((0, cout_pad - Cout), (0, 0)))
        shift = jnp.pad(shift, (0, cout_pad - Cout))
    w = w.astype(compute_dtype)
    shift2d = shift.reshape(cout_pad, 1)

    # ---- NCHW consumed directly: (N, Cin, H, W) -> (N, Cin, H*W) is a free reshape.
    x3d = x.reshape(N, Cin, HW)
    if cast_input and x3d.dtype != compute_dtype:
        # Ideally the upstream `features` stack already emits bf16 activations; this
        # one-off cast halves the kernel's HBM read traffic either way.
        x3d = x3d.astype(compute_dtype)
    x_itemsize = jnp.dtype(x3d.dtype).itemsize

    # ---- tile choices: HW tile + batch block, capped so the double-buffered
    # activation tile stays v7x-safe (64 MiB physical VMEM there).
    thw = _pick_hw_tile(HW, hw_tile_target)
    bn_blk = _pick_batch_block(N, max_batch_block)
    x_budget = 12 << 20
    while (2 * bn_blk * Cin * thw * x_itemsize > x_budget
           and thw % 256 == 0 and HW % (thw // 2) == 0):
        thw //= 2

    if cout_splits is None:
        # v7x megacore: if the batch axis can't feed two TensorCores, split Cout in 2
        # (costs a 2x activation re-read but keeps both cores busy at tiny batch).
        cout_splits = 2 if (N // bn_blk) < 2 and cout_pad % 256 == 0 else 1
    cout_tile = cout_pad // cout_splits

    grid = (N // bn_blk, cout_splits, HW // thw)

    # ---- VMEM budget derived from the device (v7x: 64 MiB, v5e/v6e: 128 MiB)
    try:
        vmem_cap = int(pltpu.get_tpu_info().vmem_capacity_bytes)
    except Exception:  # interpret mode / older runtimes
        vmem_cap = 64 << 20
    lane = lambda d: _round_up(d, 128)
    sub = lambda d: _round_up(d, 8)
    est = (2 * bn_blk * sub(Cin) * lane(thw) * x_itemsize                      # x tile
           + 2 * sub(cout_tile) * lane(Cin) * jnp.dtype(compute_dtype).itemsize  # weight
           + 2 * sub(cout_tile) * lane(1) * 4                                  # shift
           + 2 * sub(bn_blk) * lane(cout_tile) * 4                             # out tile
           + sub(cout_tile) * lane(bn_blk) * 4)                                # acc scratch
    vmem_limit = int(min(max(est + est // 4 + (4 << 20), 32 << 20),
                         max(vmem_cap - (4 << 20), 32 << 20)))

    kernel = functools.partial(_head_kernel, inv_hw=1.0 / HW, bn=bn_blk)

    out = pl.pallas_call(
        kernel,
        out_shape=jax.ShapeDtypeStruct((N, cout_pad), out_dtype),
        grid_spec=pltpu.PrefetchScalarGridSpec(
            num_scalar_prefetch=0,
            grid=grid,
            in_specs=[
                pl.BlockSpec((bn_blk, Cin, thw), lambda n, j, k: (n, 0, k)),
                # constant over n and k -> weight/shift DMA'd once (VMEM-resident)
                pl.BlockSpec((cout_tile, Cin), lambda n, j, k: (j, 0)),
                pl.BlockSpec((cout_tile, 1), lambda n, j, k: (j, 0)),
            ],
            out_specs=pl.BlockSpec((bn_blk, cout_tile), lambda n, j, k: (n, j)),
            scratch_shapes=[pltpu.VMEM((cout_tile, bn_blk), jnp.float32)],
        ),
        compiler_params=pltpu.CompilerParams(
            dimension_semantics=("parallel", "parallel", "arbitrary"),
            vmem_limit_bytes=vmem_limit,
        ),
    )(x3d, w, shift2d)

    return out[:, :Cout]


def vgg_head_ref(x, weight, *, bias=None, bn_params=None):
    """Pure-JAX reference (conv + BN + ReLU + global avg pool + flatten)."""
    w4 = weight.reshape(weight.shape[0], weight.shape[1], 1, 1)
    out = jax.lax.conv_general_dilated(
        x, w4, window_strides=(1, 1), padding="VALID",
        dimension_numbers=("NCHW", "OIHW", "NCHW"))
    if bias is not None:
        out = out + bias.reshape(1, -1, 1, 1)
    if bn_params is not None:
        g = bn_params["gamma"].reshape(1, -1, 1, 1)
        b = bn_params["beta"].reshape(1, -1, 1, 1)
        m = bn_params["mean"].reshape(1, -1, 1, 1)
        v = bn_params["var"].reshape(1, -1, 1, 1)
        out = (out - m) / jnp.sqrt(v + bn_params.get("eps", 1e-5)) * g + b
    out = jnp.maximum(out, 0.0)
    return jnp.mean(out, axis=(2, 3))


if __name__ == "__main__":
    key = jax.random.PRNGKey(0)
    k_x, k_w, k_b, k_bn = jax.random.split(key, 4)

    # Small shapes consistent with the module's `reduce` head
    # (the real layer is Conv2d(512, num_class, kernel_size=1); scaled down here).
    N, Cin, Cout, H, W = 2, 4, 8, 16, 16

    x = jax.random.normal(k_x, (N, Cin, H, W), dtype=jnp.float32)
    weight = jax.random.normal(k_w, (Cout, Cin), dtype=jnp.float32) * 0.1
    bias = jax.random.normal(k_b, (Cout,), dtype=jnp.float32) * 0.1

    # bn=False branch: Conv2d(bias=True) + ReLU + GAP + flatten
    out = jax.block_until_ready(vgg_head(x, weight, bias=bias))
    ref = vgg_head_ref(x, weight, bias=bias)
    assert out.shape == ref.shape == (N, Cout)
    assert jnp.allclose(out, ref, atol=2e-2, rtol=2e-2), \
        float(jnp.max(jnp.abs(out - ref)))

    # bn=True branch: Conv2d(bias=True) + BatchNorm2d (inference) + ReLU + GAP
    kg, kb2, km, kv = jax.random.split(k_bn, 4)
    bn_params = dict(
        gamma=1.0 + 0.1 * jax.random.normal(kg, (Cout,), jnp.float32),
        beta=0.1 * jax.random.normal(kb2, (Cout,), jnp.float32),
        mean=0.1 * jax.random.normal(km, (Cout,), jnp.float32),
        var=jax.random.uniform(kv, (Cout,), jnp.float32, 0.5, 1.5),
        eps=1e-5,
    )
    out_bn = jax.block_until_ready(vgg_head(x, weight, bias=bias, bn_params=bn_params))
    ref_bn = vgg_head_ref(x, weight, bias=bias, bn_params=bn_params)
    assert out_bn.shape == ref_bn.shape == (N, Cout)
    assert jnp.allclose(out_bn, ref_bn, atol=2e-2, rtol=2e-2), \
        float(jnp.max(jnp.abs(out_bn - ref_bn)))

    # Extra config: multi-batch block + multi-step HW reduction axis (k > 1).
    N2, Cin2, Cout2, H2, W2 = 4, 8, 16, 32, 32
    kx2, kw2, kb3 = jax.random.split(jax.random.PRNGKey(1), 3)
    x2 = jax.random.normal(kx2, (N2, Cin2, H2, W2), dtype=jnp.float32)
    w2 = jax.random.normal(kw2, (Cout2, Cin2), dtype=jnp.float32) * 0.1
    b2 = jax.random.normal(kb3, (Cout2,), dtype=jnp.float32) * 0.1
    out2 = jax.block_until_ready(vgg_head(x2, w2, bias=b2, hw_tile_target=512))
    ref2 = vgg_head_ref(x2, w2, bias=b2)
    assert out2.shape == ref2.shape == (N2, Cout2)
    assert jnp.allclose(out2, ref2, atol=2e-2, rtol=2e-2), \
        float(jnp.max(jnp.abs(out2 - ref2)))

    print("KERNEL_OK")
</pallas_src>

<mosaic_0001>
module attributes {stable_mosaic.version = 11 : i64} {
  func.func @_head_kernel(%arg0: i32, %arg1: i32, %arg2: i32, %arg3: memref<2x4x256xbf16, #tpu.memory_space<vmem>>, %arg4: memref<128x4xbf16, #tpu.memory_space<vmem>>, %arg5: memref<128x1xf32, #tpu.memory_space<vmem>>, %arg6: memref<2x128xf32, #tpu.memory_space<vmem>>, %arg7: memref<128x2xf32, #tpu.memory_space<vmem>>) attributes {dimension_semantics = [#tpu.dimension_semantics<parallel>, #tpu.dimension_semantics<parallel>, #tpu.dimension_semantics<arbitrary>], iteration_bounds = array<i64: 1, 1, 1>, scalar_prefetch = 0 : i64, scratch_operands = 1 : i64, tpu.core_type = #tpu.core_type<tc>, window_params = [{transform_indices = @transform_0, window_bounds = array<i64: 2, 4, 256>}, {transform_indices = @transform_1, window_bounds = array<i64: 128, 4>}, {transform_indices = @transform_2, window_bounds = array<i64: 128, 1>}, {transform_indices = @transform_3, window_bounds = array<i64: 2, 128>}]} {
    %c0_i32 = arith.constant 0 : i32
    %0 = arith.cmpi eq, %arg2, %c0_i32 : i32
    %1 = arith.extui %0 : i1 to i32
    %c0_i32_0 = arith.constant 0 : i32
    %2 = arith.cmpi ne, %1, %c0_i32_0 : i32
    scf.if %2 {
      %cst_24 = arith.constant 0.000000e+00 : f32
      %32 = vector.broadcast %cst_24 : f32 to vector<128x2xf32>
      %c0_25 = arith.constant 0 : index
      %c0_26 = arith.constant 0 : index
      %33 = vector.load %arg7[%c0_25, %c0_26] : memref<128x2xf32, #tpu.memory_space<vmem>>, vector<128x2xf32>
      tpu.vector_store %arg7[%c0_25, %c0_26], %32 {strides = array<i32>} : memref<128x2xf32, #tpu.memory_space<vmem>>, vector<128x2xf32>,
    } else {
    }
    %c0 = arith.constant 0 : index
    %c0_1 = arith.constant 0 : index
    %c0_2 = arith.constant 0 : index
    %3 = vector.load %arg3[%c0, %c0_1, %c0_2] : memref<2x4x256xbf16, #tpu.memory_space<vmem>>, vector<1x4x256xbf16>
    %4 = vector.shape_cast %3 : vector<1x4x256xbf16> to vector<4x256xbf16>
    %c0_3 = arith.constant 0 : index
    %c0_4 = arith.constant 0 : index
    %5 = vector.load %arg4[%c0_3, %c0_4] : memref<128x4xbf16, #tpu.memory_space<vmem>>, vector<128x4xbf16>
    %cst = arith.constant dense<0.000000e+00> : vector<128x256xf32>
    %6 = tpu.matmul %5, %4, %cst {dimension_numbers = #tpu.dot_dimension_numbers<[1], [0], [0], [1], [0, 0, 1, 1], [], []>} : vector<128x4xbf16>, vector<4x256xbf16>, vector<128x256xf32> -> vector<128x256xf32>
    %c0_5 = arith.constant 0 : index
    %c0_6 = arith.constant 0 : index
    %7 = vector.load %arg5[%c0_5, %c0_6] : memref<128x1xf32, #tpu.memory_space<vmem>>, vector<128x1xf32>
    %8 = vector.broadcast %7 : vector<128x1xf32> to vector<128x256xf32>
    %9 = arith.addf %6, %8 : vector<128x256xf32>
    %cst_7 = arith.constant 0.000000e+00 : f32
    %10 = vector.broadcast %cst_7 : f32 to vector<128x256xf32>
    %11 = arith.maximumf %9, %10 : vector<128x256xf32>
    %cst_8 = arith.constant dense<0.000000e+00> : vector<128xf32>
    %12 = vector.multi_reduction <add>, %11, %cst_8 [1] : vector<128x256xf32> to vector<128xf32>
    %13 = vector.shape_cast %12 : vector<128xf32> to vector<128x1xf32>
    %c1 = arith.constant 1 : index
    %c0_9 = arith.constant 0 : index
    %c0_10 = arith.constant 0 : index
    %14 = vector.load %arg3[%c1, %c0_9, %c0_10] : memref<2x4x256xbf16, #tpu.memory_space<vmem>>, vector<1x4x256xbf16>
    %15 = vector.shape_cast %14 : vector<1x4x256xbf16> to vector<4x256xbf16>
    %c0_11 = arith.constant 0 : index
    %c0_12 = arith.constant 0 : index
    %16 = vector.load %arg4[%c0_11, %c0_12] : memref<128x4xbf16, #tpu.memory_space<vmem>>, vector<128x4xbf16>
    %cst_13 = arith.constant dense<0.000000e+00> : vector<128x256xf32>
    %17 = tpu.matmul %16, %15, %cst_13 {dimension_numbers = #tpu.dot_dimension_numbers<[1], [0], [0], [1], [0, 0, 1, 1], [], []>} : vector<128x4xbf16>, vector<4x256xbf16>, vector<128x256xf32> -> vector<128x256xf32>
    %c0_14 = arith.constant 0 : index
    %c0_15 = arith.constant 0 : index
    %18 = vector.load %arg5[%c0_14, %c0_15] : memref<128x1xf32, #tpu.memory_space<vmem>>, vector<128x1xf32>
    %19 = vector.broadcast %18 : vector<128x1xf32> to vector<128x256xf32>
    %20 = arith.addf %17, %19 : vector<128x256xf32>
    %cst_16 = arith.constant 0.000000e+00 : f32
    %21 = vector.broadcast %cst_16 : f32 to vector<128x256xf32>
    %22 = arith.maximumf %20, %21 : vector<128x256xf32>
    %cst_17 = arith.constant dense<0.000000e+00> : vector<128xf32>
    %23 = vector.multi_reduction <add>, %22, %cst_17 [1] : vector<128x256xf32> to vector<128xf32>
    %24 = vector.shape_cast %23 : vector<128xf32> to vector<128x1xf32>
    %c0_18 = arith.constant 0 : index
    %c0_19 = arith.constant 0 : index
    %25 = vector.load %arg7[%c0_18, %c0_19] : memref<128x2xf32, #tpu.memory_space<vmem>>, vector<128x2xf32>
    %26 = tpu.concatenate %13, %24 in 1 : vector<128x1xf32>, vector<128x1xf32> -> vector<128x2xf32>
    %27 = arith.addf %25, %26 : vector<128x2xf32>
    %c0_20 = arith.constant 0 : index
    %c0_21 = arith.constant 0 : index
    %28 = vector.load %arg7[%c0_20, %c0_21] : memref<128x2xf32, #tpu.memory_space<vmem>>, vector<128x2xf32>
    tpu.vector_store %arg7[%c0_20, %c0_21], %27 {strides = array<i32>} : memref<128x2xf32, #tpu.memory_space<vmem>>, vector<128x2xf32>,
    %c0_i32_22 = arith.constant 0 : i32
    %29 = arith.cmpi eq, %arg2, %c0_i32_22 : i32
    %30 = arith.extui %29 : i1 to i32
    %c0_i32_23 = arith.constant 0 : i32
    %31 = arith.cmpi ne, %30, %c0_i32_23 : i32
    scf.if %31 {
      %c0_24 = arith.constant 0 : index
      %c0_25 = arith.constant 0 : index
      %32 = vector.load %arg7[%c0_24, %c0_25] : memref<128x2xf32, #tpu.memory_space<vmem>>, vector<128x2xf32>
      %cst_26 = arith.constant 3.906250e-03 : f32
      %33 = vector.broadcast %cst_26 : f32 to vector<128x2xf32>
      %34 = arith.mulf %32, %33 : vector<128x2xf32>
      %35 = tpu.transpose %34, [1, 0] : vector<128x2xf32> -> vector<2x128xf32>
      %c0_27 = arith.constant 0 : index
      %c0_28 = arith.constant 0 : index
      %36 = vector.load %arg6[%c0_27, %c0_28] : memref<2x128xf32, #tpu.memory_space<vmem>>, vector<2x128xf32>
      tpu.vector_store %arg6[%c0_27, %c0_28], %35 {strides = array<i32>} : memref<2x128xf32, #tpu.memory_space<vmem>>, vector<2x128xf32>,
    } else {
    }
    return
  }
  func.func @transform_0(%arg0: i32, %arg1: i32, %arg2: i32) -> (i32, i32, i32) {
    %c0_i32 = arith.constant 0 : i32
    %c0_i32_0 = arith.constant 0 : i32
    return %arg0, %c0_i32, %arg2 : i32, i32, i32
  }
  func.func @transform_1(%arg0: i32, %arg1: i32, %arg2: i32) -> (i32, i32) {
    %c0_i32 = arith.constant 0 : i32
    %c0_i32_0 = arith.constant 0 : i32
    return %arg1, %c0_i32 : i32, i32
  }
  func.func @transform_2(%arg0: i32, %arg1: i32, %arg2: i32) -> (i32, i32) {
    %c0_i32 = arith.constant 0 : i32
    %c0_i32_0 = arith.constant 0 : i32
    return %arg1, %c0_i32 : i32, i32
  }
  func.func @transform_3(%arg0: i32, %arg1: i32, %arg2: i32) -> (i32, i32) {
    %c0_i32 = arith.constant 0 : i32
    return %arg0, %arg1 : i32, i32
  }
}

</mosaic_0001>

<bundles_post_ra>
// kernel: tpu_custom_call.1
= control target key start
LH: loop header
LB: loop body
LE: loop exit
PB: predicated region body
PF: predicated region fallthrough
CT: control target
= control target key end

     0   :  { %vm224_vm0 = vcmask 1041408   ;;  %v846_v4 = vmov 0   ;;  %vm199_vm1 = vcmask 31744   ;;  %s1032_s0 = inlined_call_operand.vmem [shape: bf16[2,4,256], index: 0, kind: input, shape index: {}]   ;;  %s1033_s1 = inlined_call_operand.vmem [shape: bf16[128,4], index: 1, kind: input, shape index: {}]   ;;  %s1034_s2 = inlined_call_operand.vmem [shape: f32[128,1], index: 2, kind: input, shape index: {}]   ;;  %s1035_s3 = inlined_call_operand.hbm [shape: f32[2,128], index: 3, kind: output, shape index: {}]  }
   0x1   :  { %v790_v0 = vld.sshfl [vmem:[%s1032_s0] sm:$0x33 pattern:$0x76325410]  ;;  %263 = vmatprep.mubr.bf16.mxu0 %v846_v4  ;;  %473 = vmatprep.mubr.bf16.mxu1 %v846_v4  ;;  %v55_v9 = vld [vmem:[%s1034_s2 + $0x8] sm:$0xff]  ;;  %v56_v10 = vld [vmem:[%s1034_s2 + $0x10] sm:$0xff] }
   0x2   :  { %v198_v1 = vcombine.high %v790_v0, %v790_v0  ;;  %v801_v2 = vld.sshfl [vmem:[%s1032_s0 + $0x4] sm:$0x33 pattern:$0x76325410]  ;;  %v226_v3 = vsel %vm224_vm0, %v790_v0, 0  ;;  %814 = vset.pattern.permute.xlu0 %v846_v4  ;;  %815 = vset.pattern.permute.xlu1 %v846_v4  ;;  %v817_v11 = vld [vmem:[%s1033_s1 + $0x8] sm:$0xff]  }
   0x3   :  { %v434_v5 = vcombine.high %v801_v2, %v801_v2  ;;  %v436_v6 = vsel %vm224_vm0, %v801_v2, 0  ;;  %v816_v7 = vld [vmem:[%s1033_s1] sm:$0xff]   ;;  %82 = vperm.xlu1 %815, %v56_v10   ;;  %v57_v12 = vld [vmem:[%s1034_s2 + $0x18] sm:$0xff] }
   0x4   :  { %791 = vmatprep.subr.msk.bf16.mxu0 %vm224_vm0, %v198_v1  ;;  %v54_v8 = vld [vmem:[%s1034_s2] sm:$0xff] }
   0x5   :  { %802 = vmatprep.subr.msk.bf16.mxu1 %vm224_vm0, %v434_v5  ;;  %246 = vmatpush1.bf16.msra.mxu0 %v226_v3  ;;  %v58_v13 = vld [vmem:[%s1034_s2 + $0x20] sm:$0xff] }
   0x6   :  { %456 = vmatpush1.bf16.msra.mxu1 %v436_v6  ;;  %72 = vperm.xlu0 %814, %v54_v8  }
   0x7   :  { %87 = vperm.xlu1 %815, %v57_v12  }
   0x8   :  { %792 = vmatmul.mubr.msk.bf16.vlgmr.msra.gmra.mxu0 %vm199_vm1, %v816_v7 }
   0x9   :  { %803 = vmatmul.mubr.msk.bf16.vlgmr.msra.gmra.mxu1 %vm199_vm1, %v816_v7  ;;  %273 = vmatprep.mubr.bf16.mxu0 %v846_v4 }
   0xa   :  { %483 = vmatprep.mubr.bf16.mxu1 %v846_v4  ;;  %77 = vperm.xlu0 %814, %v55_v9  }
  0x10   :  { %793 = vmatmul.mubr.msk.bf16.gmra.mxu0 %vm199_vm1, %v817_v11 }
  0x11   :  { %8 = vsyncpa [#allocation4], 0  ;;  %804 = vmatmul.mubr.msk.bf16.gmra.mxu1 %vm199_vm1, %v817_v11  ;;  %283 = vmatprep.mubr.bf16.mxu0 %v846_v4  ;;  %v59_v14 = vld [vmem:[%s1034_s2 + $0x28] sm:$0xff]  ;;  %v60_v15 = vld [vmem:[%s1034_s2 + $0x30] sm:$0xff]  ;;  %vm20_vm2 = vcmask 15360   ;;  %vm650_vm3 = vcmask 7168  }
  0x12   :  { %493 = vmatprep.mubr.bf16.mxu1 %v846_v4  ;;  %92 = vperm.xlu0 %814, %v58_v13   ;;  %v818_v16 = vld [vmem:[%s1033_s1 + $0x10] sm:$0xff]   ;;  %v61_v17 = vld [vmem:[%s1034_s2 + $0x38] sm:$0xff]  ;;  %v62_v18 = vld [vmem:[%s1034_s2 + $0x40] sm:$0xff]  ;;  %v847_v13 = vmov 0.0  }
  0x13   :  { %97 = vperm.xlu1 %815, %v59_v14   ;;  %v63_v19 = vld [vmem:[%s1034_s2 + $0x48] sm:$0xff]  ;;  %v64_v20 = vld [vmem:[%s1034_s2 + $0x50] sm:$0xff]  ;;  %v819_v21 = vld [vmem:[%s1033_s1 + $0x18] sm:$0xff]   ;;  %21 = vst.msk [vmem:[#allocation2] sm:$0xff] %vm20_vm2, %v847_v13 }
  0x14   :  { %v65_v22 = vld [vmem:[%s1034_s2 + $0x58] sm:$0xff]  ;;  %v66_v23 = vld [vmem:[%s1034_s2 + $0x60] sm:$0xff]  ;;  %v67_v24 = vld [vmem:[%s1034_s2 + $0x68] sm:$0xff]  ;;  %22 = vst.msk [vmem:[#allocation2 + $0x8] sm:$0xff] %vm20_vm2, %v847_v13 }
  0x15   :  { %v68_v25 = vld [vmem:[%s1034_s2 + $0x70] sm:$0xff]  ;;  %v820_v26 = vld [vmem:[%s1033_s1 + $0x20] sm:$0xff]   ;;  %v69_v27 = vld [vmem:[%s1034_s2 + $0x78] sm:$0xff]  ;;  %23 = vst.msk [vmem:[#allocation2 + $0x10] sm:$0xff] %vm20_vm2, %v847_v13 }
  0x16   :  { %102 = vperm.xlu0 %814, %v60_v15   ;;  %v821_v28 = vld [vmem:[%s1033_s1 + $0x28] sm:$0xff]   ;;  %v822_v29 = vld [vmem:[%s1033_s1 + $0x30] sm:$0xff]   ;;  %v823_v30 = vld [vmem:[%s1033_s1 + $0x38] sm:$0xff]   ;;  %24 = vst.msk [vmem:[#allocation2 + $0x18] sm:$0xff] %vm20_vm2, %v847_v13  ;;  %s848_s1 = smov [#allocation3]  }
  0x17   :  { %107 = vperm.xlu1 %815, %v61_v17   ;;  %25 = vst.msk [vmem:[#allocation2 + $0x20] sm:$0xff] %vm20_vm2, %v847_v13  ;;  %26 = vst.msk [vmem:[#allocation2 + $0x28] sm:$0xff] %vm20_vm2, %v847_v13  ;;  %s774_s7 = sshll.u32 %s848_s1, 4  ;;  %s775_s7 = int_to_ptr.vmem [resolvable:$true] %s774_s7 }
  0x18   :  { %794 = vmatmul.mubr.msk.bf16.gmra.mxu0 %vm199_vm1, %v818_v16  ;;  %27 = vst.msk [vmem:[#allocation2 + $0x30] sm:$0xff] %vm20_vm2, %v847_v13  ;;  %28 = vst.msk [vmem:[#allocation2 + $0x38] sm:$0xff] %vm20_vm2, %v847_v13  ;;  %s824_s8 = scalar_lea.vmem %s775_s7, 32  ;;  %p829_p1 = scmp.lt.s32.totalorder %s775_s7, %s775_s7 }
  0x19   :  { %805 = vmatmul.mubr.msk.bf16.gmra.mxu1 %vm199_vm1, %v818_v16  ;;  %293 = vmatprep.mubr.bf16.mxu0 %v846_v4  ;;  %29 = vst.msk [vmem:[#allocation2 + $0x40] sm:$0xff] %vm20_vm2, %v847_v13  ;;  %30 = vst.msk [vmem:[#allocation2 + $0x48] sm:$0xff] %vm20_vm2, %v847_v13  ;;  %p825_p0 = scmp.ne.s32.totalorder %s775_s7, %s824_s8  ;;  %p830_p2 = scmp.lt.s32.totalorder %s824_s8, %s824_s8 }
  0x1a   :  { %503 = vmatprep.mubr.bf16.mxu1 %v846_v4  ;;  %112 = vperm.xlu0 %814, %v62_v18   ;;  %31 = vst.msk [vmem:[#allocation2 + $0x50] sm:$0xff] %vm20_vm2, %v847_v13  ;;  %32 = vst.msk [vmem:[#allocation2 + $0x58] sm:$0xff] %vm20_vm2, %v847_v13 }
  0x1b   :  { %117 = vperm.xlu1 %815, %v63_v19   ;;  %33 = vst.msk [vmem:[#allocation2 + $0x60] sm:$0xff] %vm20_vm2, %v847_v13  ;;  %34 = vst.msk [vmem:[#allocation2 + $0x68] sm:$0xff] %vm20_vm2, %v847_v13  ;;  %p831_p3 = por %p830_p2, %p829_p1 }
  0x1c   :  { %35 = vst.msk [vmem:[#allocation2 + $0x70] sm:$0xff] %vm20_vm2, %v847_v13  ;;  %36 = vst.msk [vmem:[#allocation2 + $0x78] sm:$0xff] %vm20_vm2, %v847_v13 }
  0x1d   :  { %p832_p4 = pnand %p831_p3, %p825_p0 }
  0x1e   :  { %122 = vperm.xlu0 %814, %v64_v20  }
  0x1f   :  { %127 = vperm.xlu1 %815, %v65_v22  }
  0x20   :  { %795 = vmatmul.mubr.msk.bf16.gmra.mxu0 %vm199_vm1, %v819_v21 }
  0x21   :  { %806 = vmatmul.mubr.msk.bf16.gmra.mxu1 %vm199_vm1, %v819_v21  ;;  %303 = vmatprep.mubr.bf16.mxu0 %v846_v4 }
  0x22   :  { %513 = vmatprep.mubr.bf16.mxu1 %v846_v4  ;;  %132 = vperm.xlu0 %814, %v66_v23  }
  0x23   :  { %137 = vperm.xlu1 %815, %v67_v24  }
  0x26   :  { %142 = vperm.xlu0 %814, %v68_v25  }
  0x27   :  { %147 = vperm.xlu1 %815, %v69_v27  }
  0x28   :  { %796 = vmatmul.mubr.msk.bf16.gmra.mxu0 %vm199_vm1, %v820_v26 }
  0x29   :  { %807 = vmatmul.mubr.msk.bf16.gmra.mxu1 %vm199_vm1, %v820_v26  ;;  %313 = vmatprep.mubr.bf16.mxu0 %v846_v4 }
  0x2a   :  { %523 = vmatprep.mubr.bf16.mxu1 %v846_v4 }
  0x30   :  { %797 = vmatmul.mubr.msk.bf16.gmra.mxu0 %vm199_vm1, %v821_v28 }
  0x31   :  { %808 = vmatmul.mubr.msk.bf16.gmra.mxu1 %vm199_vm1, %v821_v28  ;;  %323 = vmatprep.mubr.bf16.mxu0 %v846_v4 }
  0x32   :  { %533 = vmatprep.mubr.bf16.mxu1 %v846_v4 }
  0x38   :  { %798 = vmatmul.mubr.msk.bf16.gmra.mxu0 %vm199_vm1, %v822_v29 }
  0x39   :  { %809 = vmatmul.mubr.msk.bf16.gmra.mxu1 %vm199_vm1, %v822_v29  ;;  %333 = vmatprep.mubr.bf16.mxu0 %v846_v4 }
  0x3a   :  { %543 = vmatprep.mubr.bf16.mxu1 %v846_v4 }
  0x40   :  { %799 = vmatmul.mubr.msk.bf16.gmra.mxu0 %vm199_vm1, %v823_v30 }
  0x41   :  { %810 = vmatmul.mubr.msk.bf16.gmra.mxu1 %vm199_vm1, %v823_v30 }
  0x7e   :  { %v83_v47 = vpop.permute.xlu1 %82 }
  0x81   :  { %v73_v31 = vpop.permute.xlu0 %72 }
  0x82   :  { %v88_v4 = vpop.permute.xlu1 %87 }
  0x85   :  { %v78_v39 = vpop.permute.xlu0 %77 }
  0x8d   :  { %v93_v19 = vpop.permute.xlu0 %92 }
  0xc8   :  { %v265_v32 = vpop.f32.mrf.mxu0 }
  0xc9   :  { %v266_v33 = vadd.f32 %v265_v32, %v73_v31  ;;  %v475_v34 = vpop.f32.mrf.mxu1 }
  0xca   :  { %v476_v35 = vadd.f32 %v475_v34, %v73_v31  ;;  %v267_v36 = vpop.f32.mrf.mxu0 }
  0xcb   :  { %v268_v37 = vadd.f32 %v267_v36, %v73_v31  ;;  %v477_v38 = vpop.f32.mrf.mxu1  ;;  %v344_v43 = vmax.f32 %v266_v33, 0.0  ;;  %v98_v33 = vpop.permute.xlu1 %97 }
  0xcc   :  { %v554_v40 = vmax.f32 %v476_v35, 0.0  ;;  %v478_v41 = vadd.f32 %v477_v38, %v73_v31  ;;  %v269_v42 = vpop.f32.mrf.mxu0 }
  0xcd   :  { %v345_v44 = vmax.f32 %v268_v37, 0.0  ;;  %v270_v45 = vadd.f32 %v269_v42, %v78_v39  ;;  %v479_v46 = vpop.f32.mrf.mxu1 }
  0xce   :  { %v555_v48 = vmax.f32 %v478_v41, 0.0  ;;  %v271_v49 = vpop.f32.mrf.mxu0  ;;  %v480_v57 = vadd.f32 %v479_v46, %v78_v39 }
  0xcf   :  { %v272_v50 = vadd.f32 %v271_v49, %v78_v39  ;;  %v481_v51 = vpop.f32.mrf.mxu1  ;;  %v376_v52 = vadd.f32 %v345_v44, %v344_v43  ;;  %v346_v56 = vmax.f32 %v270_v45, 0.0 }
  0xd0   :  { %v482_v53 = vadd.f32 %v481_v51, %v78_v39  ;;  %v275_v54 = vpop.f32.mrf.mxu0  ;;  %v586_v55 = vadd.f32 %v555_v48, %v554_v40  ;;  %v556_v7 = vmax.f32 %v480_v57, 0.0  ;;  %v103_v48 = vpop.permute.xlu0 %102 }
  0xd1   :  { %v347_v58 = vmax.f32 %v272_v50, 0.0  ;;  %v276_v59 = vadd.f32 %v275_v54, %v83_v47  ;;  %v485_v60 = vpop.f32.mrf.mxu1  ;;  %377 = vadd.xlane.f32.xlu0 %v376_v52 }
  0xd2   :  { %v486_v61 = vadd.f32 %v485_v60, %v83_v47  ;;  %587 = vadd.xlane.f32.xlu1 %v586_v55  ;;  %v277_v62 = vpop.f32.mrf.mxu0  ;;  %v557_v63 = vmax.f32 %v482_v53, 0.0 }
  0xd3   :  { %v348_v0 = vmax.f32 %v276_v59, 0.0  ;;  %v278_v1 = vadd.f32 %v277_v62, %v83_v47  ;;  %v487_v2 = vpop.f32.mrf.mxu1  ;;  %v379_v3 = vadd.f32 %v347_v58, %v346_v56 }
  0xd4   :  { %v488_v5 = vadd.f32 %v487_v2, %v83_v47  ;;  %v279_v6 = vpop.f32.mrf.mxu0  ;;  %v558_v11 = vmax.f32 %v486_v61, 0.0  ;;  %v589_v18 = vadd.f32 %v557_v63, %v556_v7  ;;  %v108_v63 = vpop.permute.xlu1 %107 }
  0xd5   :  { %v349_v8 = vmax.f32 %v278_v1, 0.0  ;;  %v280_v9 = vadd.f32 %v279_v6, %v88_v4  ;;  %v489_v10 = vpop.f32.mrf.mxu1  ;;  %380 = vadd.xlane.f32.xlu0 %v379_v3 }
  0xd6   :  { %v281_v12 = vpop.f32.mrf.mxu0  ;;  %v559_v14 = vmax.f32 %v488_v5, 0.0  ;;  %v490_v20 = vadd.f32 %v489_v10, %v88_v4 }
  0xd7   :  { %v282_v15 = vadd.f32 %v281_v12, %v88_v4  ;;  %v491_v16 = vpop.f32.mrf.mxu1  ;;  %v382_v17 = vadd.f32 %v349_v8, %v348_v0  ;;  %v350_v23 = vmax.f32 %v280_v9, 0.0 }
  0xd8   :  { %v492_v21 = vadd.f32 %v491_v16, %v88_v4  ;;  %v285_v22 = vpop.f32.mrf.mxu0  ;;  %v592_v32 = vadd.f32 %v559_v14, %v558_v11  ;;  %v560_v34 = vmax.f32 %v490_v20, 0.0  ;;  %v113_v14 = vpop.permute.xlu0 %112 }
  0xd9   :  { %v351_v24 = vmax.f32 %v282_v15, 0.0  ;;  %v286_v25 = vadd.f32 %v285_v22, %v93_v19  ;;  %v495_v26 = vpop.f32.mrf.mxu1  ;;  %383 = vadd.xlane.f32.xlu1 %v382_v17  ;;  %590 = vadd.xlane.f32.xlu0 %v589_v18 }
  0xda   :  { %v287_v27 = vpop.f32.mrf.mxu0  ;;  %v561_v28 = vmax.f32 %v492_v21, 0.0  ;;  %v496_v38 = vadd.f32 %v495_v26, %v93_v19 }
  0xdb   :  { %v288_v29 = vadd.f32 %v287_v27, %v93_v19  ;;  %v497_v30 = vpop.f32.mrf.mxu1  ;;  %v385_v31 = vadd.f32 %v351_v24, %v350_v23  ;;  %v352_v37 = vmax.f32 %v286_v25, 0.0 }
  0xdc   :  { %v498_v35 = vadd.f32 %v497_v30, %v93_v19  ;;  %v289_v36 = vpop.f32.mrf.mxu0  ;;  %v595_v47 = vadd.f32 %v561_v28, %v560_v34  ;;  %v562_v52 = vmax.f32 %v496_v38, 0.0 }
  0xdd   :  { %v353_v39 = vmax.f32 %v288_v29, 0.0  ;;  %v290_v40 = vadd.f32 %v289_v36, %v98_v33  ;;  %v499_v41 = vpop.f32.mrf.mxu1  ;;  %386 = vadd.xlane.f32.xlu1 %v385_v31  ;;  %593 = vadd.xlane.f32.xlu0 %v592_v32  ;;  %v118_v29 = vpop.permute.xlu1 %117 }
  0xde   :  { %v291_v42 = vpop.f32.mrf.mxu0  ;;  %v563_v43 = vmax.f32 %v498_v35, 0.0  ;;  %v500_v49 = vadd.f32 %v499_v41, %v98_v33 }
  0xdf   :  { %v292_v44 = vadd.f32 %v291_v42, %v98_v33  ;;  %v501_v45 = vpop.f32.mrf.mxu1  ;;  %v388_v46 = vadd.f32 %v353_v39, %v352_v37  ;;  %v354_v53 = vmax.f32 %v290_v40, 0.0 }
  0xe0   :  { %v502_v50 = vadd.f32 %v501_v45, %v98_v33  ;;  %v295_v51 = vpop.f32.mrf.mxu0  ;;  %v598_v62 = vadd.f32 %v563_v43, %v562_v52  ;;  %v564_v0 = vmax.f32 %v500_v49, 0.0 }
  0xe1   :  { %v355_v54 = vmax.f32 %v292_v44, 0.0  ;;  %v296_v55 = vadd.f32 %v295_v51, %v103_v48  ;;  %v505_v56 = vpop.f32.mrf.mxu1  ;;  %389 = vadd.xlane.f32.xlu1 %v388_v46  ;;  %596 = vadd.xlane.f32.xlu0 %v595_v47  ;;  %v123_v44 = vpop.permute.xlu0 %122 }
  0xe2   :  { %v297_v57 = vpop.f32.mrf.mxu0  ;;  %v565_v58 = vmax.f32 %v502_v50, 0.0  ;;  %v506_v4 = vadd.f32 %v505_v56, %v103_v48 }
  0xe3   :  { %v298_v59 = vadd.f32 %v297_v57, %v103_v48  ;;  %v507_v60 = vpop.f32.mrf.mxu1  ;;  %v391_v61 = vadd.f32 %v355_v54, %v354_v53  ;;  %v356_v3 = vmax.f32 %v296_v55, 0.0 }
  0xe4   :  { %v508_v1 = vadd.f32 %v507_v60, %v103_v48  ;;  %v299_v2 = vpop.f32.mrf.mxu0  ;;  %v601_v13 = vadd.f32 %v565_v58, %v564_v0  ;;  %v566_v18 = vmax.f32 %v506_v4, 0.0 }
  0xe5   :  { %v357_v5 = vmax.f32 %v298_v59, 0.0  ;;  %v300_v6 = vadd.f32 %v299_v2, %v108_v63  ;;  %v509_v7 = vpop.f32.mrf.mxu1  ;;  %392 = vadd.xlane.f32.xlu1 %v391_v61  ;;  %599 = vadd.xlane.f32.xlu0 %v598_v62  ;;  %v128_v59 = vpop.permute.xlu1 %127 }
  0xe6   :  { %v301_v8 = vpop.f32.mrf.mxu0  ;;  %v567_v9 = vmax.f32 %v508_v1, 0.0  ;;  %v510_v15 = vadd.f32 %v509_v7, %v108_v63 }
  0xe7   :  { %v302_v10 = vadd.f32 %v301_v8, %v108_v63  ;;  %v511_v11 = vpop.f32.mrf.mxu1  ;;  %v394_v12 = vadd.f32 %v357_v5, %v356_v3  ;;  %v358_v19 = vmax.f32 %v300_v6, 0.0 }
  0xe8   :  { %v512_v16 = vadd.f32 %v511_v11, %v108_v63  ;;  %v305_v17 = vpop.f32.mrf.mxu0  ;;  %v604_v28 = vadd.f32 %v567_v9, %v566_v18  ;;  %v568_v30 = vmax.f32 %v510_v15, 0.0 }
  0xe9   :  { %v359_v20 = vmax.f32 %v302_v10, 0.0  ;;  %v306_v21 = vadd.f32 %v305_v17, %v113_v14  ;;  %v515_v22 = vpop.f32.mrf.mxu1  ;;  %395 = vadd.xlane.f32.xlu1 %v394_v12  ;;  %602 = vadd.xlane.f32.xlu0 %v601_v13  ;;  %v133_v10 = vpop.permute.xlu0 %132 }
  0xea   :  { %v307_v23 = vpop.f32.mrf.mxu0  ;;  %v569_v24 = vmax.f32 %v512_v16, 0.0  ;;  %v516_v34 = vadd.f32 %v515_v22, %v113_v14 }
  0xeb   :  { %v308_v25 = vadd.f32 %v307_v23, %v113_v14  ;;  %v517_v26 = vpop.f32.mrf.mxu1  ;;  %v397_v27 = vadd.f32 %v359_v20, %v358_v19  ;;  %v360_v33 = vmax.f32 %v306_v21, 0.0 }
  0xec   :  { %v518_v31 = vadd.f32 %v517_v26, %v113_v14  ;;  %v309_v32 = vpop.f32.mrf.mxu0  ;;  %v607_v43 = vadd.f32 %v569_v24, %v568_v30  ;;  %v570_v48 = vmax.f32 %v516_v34, 0.0 }
  0xed   :  { %v361_v35 = vmax.f32 %v308_v25, 0.0  ;;  %v310_v36 = vadd.f32 %v309_v32, %v118_v29  ;;  %v519_v37 = vpop.f32.mrf.mxu1  ;;  %398 = vadd.xlane.f32.xlu1 %v397_v27  ;;  %605 = vadd.xlane.f32.xlu0 %v604_v28  ;;  %v138_v25 = vpop.permute.xlu1 %137 }
  0xee   :  { %v311_v38 = vpop.f32.mrf.mxu0  ;;  %v571_v39 = vmax.f32 %v518_v31, 0.0  ;;  %v520_v45 = vadd.f32 %v519_v37, %v118_v29 }
  0xef   :  { %v312_v40 = vadd.f32 %v311_v38, %v118_v29  ;;  %v521_v41 = vpop.f32.mrf.mxu1  ;;  %v400_v42 = vadd.f32 %v361_v35, %v360_v33  ;;  %v362_v49 = vmax.f32 %v310_v36, 0.0 }
  0xf0   :  { %v522_v46 = vadd.f32 %v521_v41, %v118_v29  ;;  %v315_v47 = vpop.f32.mrf.mxu0  ;;  %v610_v58 = vadd.f32 %v571_v39, %v570_v48  ;;  %v572_v60 = vmax.f32 %v520_v45, 0.0 }
  0xf1   :  { %v363_v50 = vmax.f32 %v312_v40, 0.0  ;;  %v316_v51 = vadd.f32 %v315_v47, %v123_v44  ;;  %v525_v52 = vpop.f32.mrf.mxu1  ;;  %401 = vadd.xlane.f32.xlu1 %v400_v42  ;;  %608 = vadd.xlane.f32.xlu0 %v607_v43  ;;  %v143_v40 = vpop.permute.xlu0 %142 }
  0xf2   :  { %v317_v53 = vpop.f32.mrf.mxu0  ;;  %v573_v54 = vmax.f32 %v522_v46, 0.0  ;;  %v526_v0 = vadd.f32 %v525_v52, %v123_v44 }
  0xf3   :  { %v318_v55 = vadd.f32 %v317_v53, %v123_v44  ;;  %v527_v56 = vpop.f32.mrf.mxu1  ;;  %v403_v57 = vadd.f32 %v363_v50, %v362_v49  ;;  %v364_v63 = vmax.f32 %v316_v51, 0.0 }
  0xf4   :  { %v528_v61 = vadd.f32 %v527_v56, %v123_v44  ;;  %v319_v62 = vpop.f32.mrf.mxu0  ;;  %v613_v9 = vadd.f32 %v573_v54, %v572_v60  ;;  %v574_v14 = vmax.f32 %v526_v0, 0.0 }
  0xf5   :  { %v365_v1 = vmax.f32 %v318_v55, 0.0  ;;  %v320_v2 = vadd.f32 %v319_v62, %v128_v59  ;;  %v529_v3 = vpop.f32.mrf.mxu1  ;;  %404 = vadd.xlane.f32.xlu1 %v403_v57  ;;  %611 = vadd.xlane.f32.xlu0 %v610_v58  ;;  %v148_v55 = vpop.permute.xlu1 %147 }
  0xf6   :  { %v321_v4 = vpop.f32.mrf.mxu0  ;;  %v575_v5 = vmax.f32 %v528_v61, 0.0  ;;  %v530_v11 = vadd.f32 %v529_v3, %v128_v59 }
  0xf7   :  { %v322_v6 = vadd.f32 %v321_v4, %v128_v59  ;;  %v531_v7 = vpop.f32.mrf.mxu1  ;;  %v406_v8 = vadd.f32 %v365_v1, %v364_v63  ;;  %v366_v15 = vmax.f32 %v320_v2, 0.0 }
  0xf8   :  { %v532_v12 = vadd.f32 %v531_v7, %v128_v59  ;;  %v325_v13 = vpop.f32.mrf.mxu0  ;;  %v616_v24 = vadd.f32 %v575_v5, %v574_v14  ;;  %v576_v26 = vmax.f32 %v530_v11, 0.0 }
  0xf9   :  { %v367_v16 = vmax.f32 %v322_v6, 0.0  ;;  %v326_v17 = vadd.f32 %v325_v13, %v133_v10  ;;  %v535_v18 = vpop.f32.mrf.mxu1  ;;  %407 = vadd.xlane.f32.xlu1 %v406_v8  ;;  %614 = vadd.xlane.f32.xlu0 %v613_v9 }
  0xfa   :  { %v327_v19 = vpop.f32.mrf.mxu0  ;;  %v577_v20 = vmax.f32 %v532_v12, 0.0  ;;  %v536_v30 = vadd.f32 %v535_v18, %v133_v10 }
  0xfb   :  { %v328_v21 = vadd.f32 %v327_v19, %v133_v10  ;;  %v537_v22 = vpop.f32.mrf.mxu1  ;;  %v409_v23 = vadd.f32 %v367_v16, %v366_v15  ;;  %v368_v29 = vmax.f32 %v326_v17, 0.0  ;;  %v634_v17 = vld [vmem:[#allocation2] sm:$0xff] }
  0xfc   :  { %v538_v27 = vadd.f32 %v537_v22, %v133_v10  ;;  %v329_v28 = vpop.f32.mrf.mxu0  ;;  %v619_v39 = vadd.f32 %v577_v20, %v576_v26  ;;  %v578_v44 = vmax.f32 %v536_v30, 0.0  ;;  %v635_v22 = vld [vmem:[#allocation2 + $0x8] sm:$0xff] }
  0xfd   :  { %v369_v31 = vmax.f32 %v328_v21, 0.0  ;;  %v330_v32 = vadd.f32 %v329_v28, %v138_v25  ;;  %v539_v33 = vpop.f32.mrf.mxu1  ;;  %410 = vadd.xlane.f32.xlu1 %v409_v23  ;;  %617 = vadd.xlane.f32.xlu0 %v616_v24 }
  0xfe   :  { %v331_v34 = vpop.f32.mrf.mxu0  ;;  %v579_v35 = vmax.f32 %v538_v27, 0.0  ;;  %v540_v41 = vadd.f32 %v539_v33, %v138_v25  ;;  %v636_v27 = vld [vmem:[#allocation2 + $0x10] sm:$0xff] }
  0xff   :  { %v332_v36 = vadd.f32 %v331_v34, %v138_v25  ;;  %v541_v37 = vpop.f32.mrf.mxu1  ;;  %v412_v38 = vadd.f32 %v369_v31, %v368_v29  ;;  %v370_v45 = vmax.f32 %v330_v32, 0.0  ;;  %v637_v34 = vld [vmem:[#allocation2 + $0x18] sm:$0xff] }
 0x100   :  { %v542_v42 = vadd.f32 %v541_v37, %v138_v25  ;;  %v335_v43 = vpop.f32.mrf.mxu0  ;;  %v622_v54 = vadd.f32 %v579_v35, %v578_v44  ;;  %v580_v56 = vmax.f32 %v540_v41, 0.0 }
 0x101   :  { %v371_v46 = vmax.f32 %v332_v36, 0.0  ;;  %v336_v47 = vadd.f32 %v335_v43, %v143_v40  ;;  %v545_v48 = vpop.f32.mrf.mxu1  ;;  %413 = vadd.xlane.f32.xlu1 %v412_v38  ;;  %620 = vadd.xlane.f32.xlu0 %v619_v39  ;;  %v638_v39 = vld [vmem:[#allocation2 + $0x20] sm:$0xff] }
 0x102   :  { %v337_v49 = vpop.f32.mrf.mxu0  ;;  %v581_v50 = vmax.f32 %v542_v42, 0.0  ;;  %v546_v60 = vadd.f32 %v545_v48, %v143_v40 }
 0x103   :  { %v338_v51 = vadd.f32 %v337_v49, %v143_v40  ;;  %v547_v52 = vpop.f32.mrf.mxu1  ;;  %v415_v53 = vadd.f32 %v371_v46, %v370_v45  ;;  %v372_v59 = vmax.f32 %v336_v47, 0.0  ;;  %v639_v46 = vld [vmem:[#allocation2 + $0x28] sm:$0xff] }
 0x104   :  { %v548_v57 = vadd.f32 %v547_v52, %v143_v40  ;;  %v339_v58 = vpop.f32.mrf.mxu0  ;;  %v625_v5 = vadd.f32 %v581_v50, %v580_v56  ;;  %v582_v7 = vmax.f32 %v546_v60, 0.0  ;;  %v641_v60 = vld [vmem:[#allocation2 + $0x38] sm:$0xff] }
 0x105   :  { %v373_v61 = vmax.f32 %v338_v51, 0.0  ;;  %v340_v62 = vadd.f32 %v339_v58, %v148_v55  ;;  %v549_v63 = vpop.f32.mrf.mxu1  ;;  %416 = vadd.xlane.f32.xlu1 %v415_v53  ;;  %623 = vadd.xlane.f32.xlu0 %v622_v54  ;;  %v640_v53 = vld [vmem:[#allocation2 + $0x30] sm:$0xff] }
 0x106   :  { %v341_v0 = vpop.f32.mrf.mxu0  ;;  %v583_v1 = vmax.f32 %v548_v57, 0.0  ;;  %v550_v9 = vadd.f32 %v549_v63, %v148_v55 }
 0x107   :  { %v342_v2 = vadd.f32 %v341_v0, %v148_v55  ;;  %v551_v3 = vpop.f32.mrf.mxu1  ;;  %v418_v4 = vadd.f32 %v373_v61, %v372_v59  ;;  %v374_v8 = vmax.f32 %v340_v62, 0.0 }
 0x108   :  { %v552_v6 = vadd.f32 %v551_v3, %v148_v55  ;;  %v628_v13 = vadd.f32 %v583_v1, %v582_v7  ;;  %v584_v14 = vmax.f32 %v550_v9, 0.0  ;;  %v642_v3 = vld [vmem:[#allocation2 + $0x40] sm:$0xff] }
 0x109   :  { %v375_v10 = vmax.f32 %v342_v2, 0.0  ;;  %419 = vadd.xlane.f32.xlu1 %v418_v4  ;;  %626 = vadd.xlane.f32.xlu0 %v625_v5 }
 0x10a   :  { %v585_v11 = vmax.f32 %v552_v6, 0.0 }
 0x10b   :  { %v421_v12 = vadd.f32 %v375_v10, %v374_v8  ;;  %v643_v10 = vld [vmem:[#allocation2 + $0x48] sm:$0xff] }
 0x10c   :  { %v631_v15 = vadd.f32 %v585_v11, %v584_v14 }
 0x10d   :  { %422 = vadd.xlane.f32.xlu1 %v421_v12  ;;  %629 = vadd.xlane.f32.xlu0 %v628_v13 }
 0x111   :  { %632 = vadd.xlane.f32.xlu0 %v631_v15 }
 0x15a   :  { %v378_v16 = vpop.xlane.xlu0 %377 }
 0x15b   :  { %v588_v18 = vpop.xlane.xlu1 %587 }
 0x15c   :  { %v651_v19 = vsel %vm650_vm3, %v378_v16, %v588_v18 }
 0x15d   :  { %v667_v20 = vadd.f32 %v651_v19, %v634_v17  ;;  %v644_v17 = vld [vmem:[#allocation2 + $0x50] sm:$0xff] }
 0x15e   :  { %v381_v21 = vpop.xlane.xlu0 %380 }
 0x15f   :  { %684 = vst.msk [vmem:[#allocation2] sm:$0xff] %vm20_vm2, %v667_v20 }
 0x162   :  { %v384_v23 = vpop.xlane.xlu1 %383  ;;  %v591_v24 = vpop.xlane.xlu0 %590 }
 0x163   :  { %v652_v25 = vsel %vm650_vm3, %v381_v21, %v591_v24  ;;  %v645_v24 = vld [vmem:[#allocation2 + $0x58] sm:$0xff] }
 0x164   :  { %v668_v26 = vadd.f32 %v652_v25, %v635_v22 }
 0x166   :  { %685 = vst.msk [vmem:[#allocation2 + $0x8] sm:$0xff] %vm20_vm2, %v668_v26  ;;  %v387_v28 = vpop.xlane.xlu1 %386  ;;  %v594_v29 = vpop.xlane.xlu0 %593  ;;  %v703_v30 = vld [vmem:[#allocation2] sm:$0xff] }
 0x167   :  { %v653_v31 = vsel %vm650_vm3, %v384_v23, %v594_v29  ;;  %v719_v32 = vmul.f32 0.00390625, %v703_v30 }
 0x168   :  { %v669_v33 = vadd.f32 %v653_v31, %v636_v27  ;;  %v646_v31 = vld [vmem:[#allocation2 + $0x60] sm:$0xff] }
 0x169   :  { %735 = vxpose.xlu1.b32.start [1/16] (narrow) %v719_v32, 8 }
 0x16a   :  { %686 = vst.msk [vmem:[#allocation2 + $0x10] sm:$0xff] %vm20_vm2, %v669_v33  ;;  %v390_v35 = vpop.xlane.xlu1 %389  ;;  %v597_v36 = vpop.xlane.xlu0 %596 }
 0x16b   :  { %v654_v37 = vsel %vm650_vm3, %v387_v28, %v597_v36 }
 0x16c   :  { %v670_v38 = vadd.f32 %v654_v37, %v637_v34 }
 0x16d   :  { %v704_v40 = vld [vmem:[#allocation2 + $0x8] sm:$0xff] }
 0x16e   :  { %687 = vst.msk [vmem:[#allocation2 + $0x18] sm:$0xff] %vm20_vm2, %v670_v38  ;;  %v393_v41 = vpop.xlane.xlu1 %392  ;;  %v600_v42 = vpop.xlane.xlu0 %599  ;;  %v720_v43 = vmul.f32 0.00390625, %v704_v40  ;;  %v647_v38 = vld [vmem:[#allocation2 + $0x68] sm:$0xff] }
 0x16f   :  { %v655_v44 = vsel %vm650_vm3, %v390_v35, %v600_v42 }
 0x170   :  { %v671_v45 = vadd.f32 %v655_v44, %v638_v39  ;;  %736 = vxpose.xlu1.b32.cont [2/16] (narrow) %v720_v43, 8 }
 0x171   :  { %v705_v47 = vld [vmem:[#allocation2 + $0x10] sm:$0xff] }
 0x172   :  { %688 = vst.msk [vmem:[#allocation2 + $0x20] sm:$0xff] %vm20_vm2, %v671_v45  ;;  %v396_v48 = vpop.xlane.xlu1 %395  ;;  %v603_v49 = vpop.xlane.xlu0 %602  ;;  %v721_v50 = vmul.f32 0.00390625, %v705_v47  ;;  %v648_v45 = vld [vmem:[#allocation2 + $0x70] sm:$0xff] }
 0x173   :  { %v656_v51 = vsel %vm650_vm3, %v393_v41, %v603_v49 }
 0x174   :  { %v672_v52 = vadd.f32 %v656_v51, %v639_v46  ;;  %737 = vxpose.xlu1.b32.cont [3/16] (narrow) %v721_v50, 8  ;;  %v649_v51 = vld [vmem:[#allocation2 + $0x78] sm:$0xff] }
 0x175   :  { %v706_v54 = vld [vmem:[#allocation2 + $0x18] sm:$0xff] }
 0x176   :  { %689 = vst.msk [vmem:[#allocation2 + $0x28] sm:$0xff] %vm20_vm2, %v672_v52  ;;  %v399_v55 = vpop.xlane.xlu1 %398  ;;  %v606_v56 = vpop.xlane.xlu0 %605  ;;  %v722_v57 = vmul.f32 0.00390625, %v706_v54 }
 0x177   :  { %v657_v58 = vsel %vm650_vm3, %v396_v48, %v606_v56 }
 0x178   :  { %v673_v59 = vadd.f32 %v657_v58, %v640_v53  ;;  %738 = vxpose.xlu1.b32.cont [4/16] (narrow) %v722_v57, 8 }
 0x179   :  { %v707_v61 = vld [vmem:[#allocation2 + $0x20] sm:$0xff] }
 0x17a   :  { %690 = vst.msk [vmem:[#allocation2 + $0x30] sm:$0xff] %vm20_vm2, %v673_v59  ;;  %v402_v62 = vpop.xlane.xlu1 %401  ;;  %v609_v63 = vpop.xlane.xlu0 %608  ;;  %v723_v0 = vmul.f32 0.00390625, %v707_v61 }
 0x17b   :  { %v658_v1 = vsel %vm650_vm3, %v399_v55, %v609_v63 }
 0x17c   :  { %v674_v2 = vadd.f32 %v658_v1, %v641_v60  ;;  %739 = vxpose.xlu1.b32.cont [5/16] (narrow) %v723_v0, 8 }
 0x17d   :  { %v708_v4 = vld [vmem:[#allocation2 + $0x28] sm:$0xff] }
 0x17e   :  { %691 = vst.msk [vmem:[#allocation2 + $0x38] sm:$0xff] %vm20_vm2, %v674_v2  ;;  %v405_v5 = vpop.xlane.xlu1 %404  ;;  %v612_v6 = vpop.xlane.xlu0 %611  ;;  %v724_v7 = vmul.f32 0.00390625, %v708_v4 }
 0x17f   :  { %v659_v8 = vsel %vm650_vm3, %v402_v62, %v612_v6 }
 0x180   :  { %v675_v9 = vadd.f32 %v659_v8, %v642_v3  ;;  %740 = vxpose.xlu1.b32.cont [6/16] (narrow) %v724_v7, 8 }
 0x181   :  { %v709_v11 = vld [vmem:[#allocation2 + $0x30] sm:$0xff] }
 0x182   :  { %692 = vst.msk [vmem:[#allocation2 + $0x40] sm:$0xff] %vm20_vm2, %v675_v9  ;;  %v408_v12 = vpop.xlane.xlu1 %407  ;;  %v615_v13 = vpop.xlane.xlu0 %614  ;;  %v725_v14 = vmul.f32 0.00390625, %v709_v11 }
 0x183   :  { %v660_v15 = vsel %vm650_vm3, %v405_v5, %v615_v13 }
 0x184   :  { %v676_v16 = vadd.f32 %v660_v15, %v643_v10  ;;  %741 = vxpose.xlu1.b32.cont [7/16] (narrow) %v725_v14, 8 }
 0x185   :  { %v710_v18 = vld [vmem:[#allocation2 + $0x38] sm:$0xff] }
 0x186   :  { %693 = vst.msk [vmem:[#allocation2 + $0x48] sm:$0xff] %vm20_vm2, %v676_v16  ;;  %v411_v19 = vpop.xlane.xlu1 %410  ;;  %v618_v20 = vpop.xlane.xlu0 %617  ;;  %v726_v21 = vmul.f32 0.00390625, %v710_v18 }
 0x187   :  { %v661_v22 = vsel %vm650_vm3, %v408_v12, %v618_v20 }
 0x188   :  { %v677_v23 = vadd.f32 %v661_v22, %v644_v17  ;;  %742 = vxpose.xlu1.b32.cont [8/16] (narrow) %v726_v21, 8 }
 0x189   :  { %v711_v25 = vld [vmem:[#allocation2 + $0x40] sm:$0xff] }
 0x18a   :  { %694 = vst.msk [vmem:[#allocation2 + $0x50] sm:$0xff] %vm20_vm2, %v677_v23  ;;  %v414_v26 = vpop.xlane.xlu1 %413  ;;  %v621_v27 = vpop.xlane.xlu0 %620  ;;  %v727_v28 = vmul.f32 0.00390625, %v711_v25 }
 0x18b   :  { %v662_v29 = vsel %vm650_vm3, %v411_v19, %v621_v27 }
 0x18c   :  { %v678_v30 = vadd.f32 %v662_v29, %v645_v24  ;;  %743 = vxpose.xlu1.b32.cont [9/16] (narrow) %v727_v28, 8 }
 0x18d   :  { %v712_v32 = vld [vmem:[#allocation2 + $0x48] sm:$0xff] }
 0x18e   :  { %695 = vst.msk [vmem:[#allocation2 + $0x58] sm:$0xff] %vm20_vm2, %v678_v30  ;;  %v417_v33 = vpop.xlane.xlu1 %416  ;;  %v624_v34 = vpop.xlane.xlu0 %623  ;;  %v728_v35 = vmul.f32 0.00390625, %v712_v32 }
 0x18f   :  { %v663_v36 = vsel %vm650_vm3, %v414_v26, %v624_v34 }
 0x190   :  { %v679_v37 = vadd.f32 %v663_v36, %v646_v31  ;;  %744 = vxpose.xlu1.b32.cont [10/16] (narrow) %v728_v35, 8 }
 0x191   :  { %v713_v39 = vld [vmem:[#allocation2 + $0x50] sm:$0xff] }
 0x192   :  { %696 = vst.msk [vmem:[#allocation2 + $0x60] sm:$0xff] %vm20_vm2, %v679_v37  ;;  %v627_v40 = vpop.xlane.xlu0 %626  ;;  %v729_v41 = vmul.f32 0.00390625, %v713_v39  ;;  %v420_v43 = vpop.xlane.xlu1 %419 }
 0x193   :  { %v664_v42 = vsel %vm650_vm3, %v417_v33, %v627_v40 }
 0x194   :  { %v680_v44 = vadd.f32 %v664_v42, %v647_v38  ;;  %745 = vxpose.xlu1.b32.cont [11/16] (narrow) %v729_v41, 8 }
 0x195   :  { %v714_v46 = vld [vmem:[#allocation2 + $0x58] sm:$0xff] }
 0x196   :  { %697 = vst.msk [vmem:[#allocation2 + $0x68] sm:$0xff] %vm20_vm2, %v680_v44  ;;  %v630_v47 = vpop.xlane.xlu0 %629  ;;  %v730_v48 = vmul.f32 0.00390625, %v714_v46  ;;  %v423_v53 = vpop.xlane.xlu1 %422 }
 0x197   :  { %v665_v49 = vsel %vm650_vm3, %v420_v43, %v630_v47 }
 0x198   :  { %v681_v50 = vadd.f32 %v665_v49, %v648_v45  ;;  %746 = vxpose.xlu1.b32.cont [12/16] (narrow) %v730_v48, 8 }
 0x199   :  { %v715_v52 = vld [vmem:[#allocation2 + $0x60] sm:$0xff] }
 0x19a   :  { %698 = vst.msk [vmem:[#allocation2 + $0x70] sm:$0xff] %vm20_vm2, %v681_v50  ;;  %v633_v54 = vpop.xlane.xlu0 %632  ;;  %v731_v55 = vmul.f32 0.00390625, %v715_v52 }
 0x19b   :  { %v666_v56 = vsel %vm650_vm3, %v423_v53, %v633_v54 }
 0x19c   :  { %v682_v57 = vadd.f32 %v666_v56, %v649_v51  ;;  %747 = vxpose.xlu1.b32.cont [13/16] (narrow) %v731_v55, 8 }
 0x19d   :  { %v716_v58 = vld [vmem:[#allocation2 + $0x68] sm:$0xff] }
 0x19e   :  { %699 = vst.msk [vmem:[#allocation2 + $0x78] sm:$0xff] %vm20_vm2, %v682_v57  ;;  %v732_v59 = vmul.f32 0.00390625, %v716_v58 }
 0x1a0   :  { %748 = vxpose.xlu1.b32.cont [14/16] (narrow) %v732_v59, 8 }
 0x1a1   :  { %v717_v60 = vld [vmem:[#allocation2 + $0x70] sm:$0xff] }
 0x1a2   :  { %v733_v61 = vmul.f32 0.00390625, %v717_v60 }
 0x1a4   :  { %749 = vxpose.xlu1.b32.cont [15/16] (narrow) %v733_v61, 8 }
 0x1a5   :  { %v718_v62 = vld [vmem:[#allocation2 + $0x78] sm:$0xff] }
 0x1a6   :  { %v734_v63 = vmul.f32 0.00390625, %v718_v62 }
 0x1a8   :  { %750 = vxpose.xlu1.b32.end [16/16] (narrow) %v734_v63, 8 }
 0x1e8   :  { %v751_v0 = vpop.trf.xlu1 }
 0x1e9   :  { %767 = vst [vmem:[#allocation3] sm:$0x3] %v751_v0 }
 0x1ea   :  { %835 = shalt.err (!%p832_p4)
}
 0x1eb   :  { %777 = dma.vmem_to_hbm [thread:$0]  %s775_s7, 32, %s1035_s3, [#allocation4]  }
 0x1ec   :  { %844 = dma.done.wait [#allocation4], 32  }
 0x1ed   :  { %845 = vsyncadd [#allocation4], 4294967264 }
 0x1ee   :  { %781 = vsyncpa [#allocation4], 1 }

</bundles_post_ra>
